<compile_context>
chip_gen: v5e
topology: v5e:2x2
jax: 0.10.0
libtpu: 0.0.40
codegen_flags: <defaults>
</compile_context>

<pallas_src>
from functools import partial

import jax
import jax.numpy as jnp
from jax.experimental import pallas as pl
from jax.experimental.pallas import tpu as pltpu

_EPS = 1e-07


def _normalize_kernel(x_ref, o_ref, *, power, axis):
    """L_p-normalize the tile along `axis` (matches x.pow(p).sum(dim).pow(1/p))."""
    x = x_ref[...].astype(jnp.float32)
    if power == 2:
        # Cheap path: x*x on the VPU, sqrt on the EUP.
        s = jnp.sum(x * x, axis=axis, keepdims=True)
        norm = jnp.sqrt(s)
    else:
        # Matches the PyTorch module exactly: sum(x**p)**(1/p) (no abs).
        s = jnp.sum(x ** power, axis=axis, keepdims=True)
        norm = s ** (1.0 / power)
    # One exact divide per reduced slice (keeps 1e-5 tolerance), then cheap muls.
    inv = 1.0 / (norm + _EPS)
    o_ref[...] = (x * inv).astype(o_ref.dtype)


def _round_up(v, m):
    return ((v + m - 1) // m) * m


def _normalize_nc_hw(x3, power):
    """x3: (N, C, HW); L_p normalize over C (axis 1) for every (n, hw) column."""
    N, C, HW = x3.shape

    # ---- tile selection: lanes = HW (multiple of 128), C kept whole ----------
    # ~4 MiB of f32 working set per block: big enough for ~85%+ of HBM roofline,
    # small enough (x2 buffers for in + out) to fit every generation's VMEM.
    target_block_bytes = 4 * 1024 * 1024
    max_tile = max(128, (target_block_bytes // (C * 4)) // 128 * 128)
    hw_ceil = _round_up(HW, 128)
    tile_hw = min(max_tile, hw_ceil)
    # Ensure >= 2 grid steps when possible so both v7x TensorCores get work.
    if N * (hw_ceil // tile_hw) < 2 and hw_ceil >= 256:
        tile_hw = max(128, ((hw_ceil // 2) // 128) * 128)

    hw_pad = _round_up(HW, tile_hw)
    if hw_pad != HW:
        # Zero padding is safe: padded columns give 0 * 1/(0+eps) = 0, sliced off.
        x3 = jnp.pad(x3, ((0, 0), (0, 0), (0, hw_pad - HW)))

    grid = (N, hw_pad // tile_hw)
    kernel = partial(_normalize_kernel, power=power, axis=-2)

    block_bytes = C * tile_hw * x3.dtype.itemsize
    # in + out double-buffered plus f32 temporaries; cap under v7x's 64 MiB VMEM.
    vmem_limit = int(min(max(32 * 1024 * 1024, 6 * block_bytes + (2 << 20)),
                         56 * 1024 * 1024))

    out = pl.pallas_call(
        kernel,
        out_shape=jax.ShapeDtypeStruct(x3.shape, x3.dtype),
        grid_spec=pltpu.PrefetchScalarGridSpec(
            num_scalar_prefetch=0,
            grid=grid,
            in_specs=[pl.BlockSpec((1, C, tile_hw), lambda n, t: (n, 0, t))],
            out_specs=pl.BlockSpec((1, C, tile_hw), lambda n, t: (n, 0, t)),
        ),
        compiler_params=pltpu.CompilerParams(
            dimension_semantics=("parallel", "parallel"),
            vmem_limit_bytes=vmem_limit,
        ),
    )(x3)

    if hw_pad != HW:
        out = out[:, :, :HW]
    return out


def _normalize_rows(x2, power):
    """x2: (R, C) — 2-D inputs: normalize each row over its last axis."""
    R, C = x2.shape
    tile_r = min(_round_up(R, 8), 1024)
    r_pad = _round_up(R, tile_r)
    if r_pad != R:
        x2 = jnp.pad(x2, ((0, r_pad - R), (0, 0)))
    kernel = partial(_normalize_kernel, power=power, axis=-1)
    out = pl.pallas_call(
        kernel,
        out_shape=jax.ShapeDtypeStruct(x2.shape, x2.dtype),
        grid_spec=pltpu.PrefetchScalarGridSpec(
            num_scalar_prefetch=0,
            grid=(r_pad // tile_r,),
            in_specs=[pl.BlockSpec((tile_r, C), lambda i: (i, 0))],
            out_specs=pl.BlockSpec((tile_r, C), lambda i: (i, 0)),
        ),
        compiler_params=pltpu.CompilerParams(
            dimension_semantics=("parallel",),
        ),
    )(x2)
    if r_pad != R:
        out = out[:R]
    return out


def normalize(x, power=2):
    """Matches PyTorch Normalize.forward: reduce over dim=1 with Lp norm."""
    # Specialize float-but-integral powers so we stay off the exp/log EUP path.
    if isinstance(power, float) and power.is_integer():
        power = int(power)

    if x.ndim == 2:
        return _normalize_rows(x, power)
    if x.ndim >= 3:
        # Keep native NC... layout; flatten all trailing spatial dims onto the
        # 128-lane axis (contiguous reshape, no transpose / extra HBM traffic).
        N, C = x.shape[0], x.shape[1]
        hw = 1
        for d in x.shape[2:]:
            hw *= d
        out3 = _normalize_nc_hw(x.reshape(N, C, hw), power)
        return out3.reshape(x.shape)
    raise ValueError("expected input with ndim >= 2")


if __name__ == "__main__":
    key = jax.random.PRNGKey(0)
    x = jax.random.normal(key, (2, 4, 16, 16), dtype=jnp.float32)

    out = jax.block_until_ready(normalize(x, power=2))

    # Reference check (same semantics as the PyTorch module).
    norm_ref = jnp.sum(x ** 2, axis=1, keepdims=True) ** 0.5
    ref = x / (norm_ref + 1e-07)
    assert out.shape == x.shape
    assert jnp.allclose(out, ref, atol=1e-5, rtol=1e-5)

    print("KERNEL_OK")
</pallas_src>

<mosaic_0001>
module attributes {stable_mosaic.version = 11 : i64} {
  func.func @_normalize_kernel(%arg0: i32, %arg1: i32, %arg2: memref<1x4x256xf32, #tpu.memory_space<vmem>>, %arg3: memref<1x4x256xf32, #tpu.memory_space<vmem>>) attributes {dimension_semantics = [#tpu.dimension_semantics<parallel>, #tpu.dimension_semantics<parallel>], iteration_bounds = array<i64: 2, 1>, scalar_prefetch = 0 : i64, scratch_operands = 0 : i64, tpu.core_type = #tpu.core_type<tc>, window_params = [{transform_indices = @transform_0, window_bounds = array<i64: 1, 4, 256>}, {transform_indices = @transform_1, window_bounds = array<i64: 1, 4, 256>}]} {
    %c0 = arith.constant 0 : index
    %c0_0 = arith.constant 0 : index
    %c0_1 = arith.constant 0 : index
    %0 = vector.load %arg2[%c0, %c0_0, %c0_1] : memref<1x4x256xf32, #tpu.memory_space<vmem>>, vector<1x4x256xf32>
    %1 = arith.mulf %0, %0 : vector<1x4x256xf32>
    %cst = arith.constant dense<0.000000e+00> : vector<1x256xf32>
    %2 = vector.multi_reduction <add>, %1, %cst [1] : vector<1x4x256xf32> to vector<1x256xf32>
    %3 = vector.shape_cast %2 : vector<1x256xf32> to vector<1x1x256xf32>
    %4 = math.sqrt %3 : vector<1x1x256xf32>
    %cst_2 = arith.constant 1.000000e-07 : f32
    %5 = vector.broadcast %cst_2 : f32 to vector<1x1x256xf32>
    %6 = arith.addf %4, %5 : vector<1x1x256xf32>
    %cst_3 = arith.constant 1.000000e+00 : f32
    %7 = vector.broadcast %cst_3 : f32 to vector<1x1x256xf32>
    %8 = arith.divf %7, %6 : vector<1x1x256xf32>
    %9 = vector.broadcast %8 : vector<1x1x256xf32> to vector<1x4x256xf32>
    %10 = arith.mulf %0, %9 : vector<1x4x256xf32>
    %c0_4 = arith.constant 0 : index
    %c0_5 = arith.constant 0 : index
    %c0_6 = arith.constant 0 : index
    %11 = vector.load %arg3[%c0_4, %c0_5, %c0_6] : memref<1x4x256xf32, #tpu.memory_space<vmem>>, vector<1x4x256xf32>
    tpu.vector_store %arg3[%c0_4, %c0_5, %c0_6], %10 {strides = array<i32>} : memref<1x4x256xf32, #tpu.memory_space<vmem>>, vector<1x4x256xf32>,
    return
  }
  func.func @transform_0(%arg0: i32, %arg1: i32) -> (i32, i32, i32) {
    %c0_i32 = arith.constant 0 : i32
    %c0_i32_0 = arith.constant 0 : i32
    return %arg0, %c0_i32, %arg1 : i32, i32, i32
  }
  func.func @transform_1(%arg0: i32, %arg1: i32) -> (i32, i32, i32) {
    %c0_i32 = arith.constant 0 : i32
    %c0_i32_0 = arith.constant 0 : i32
    return %arg0, %c0_i32, %arg1 : i32, i32, i32
  }
}

</mosaic_0001>

<bundles_post_ra>
// kernel: tpu_custom_call.1
= control target key start
LH: loop header
LB: loop body
LE: loop exit
PB: predicated region body
PF: predicated region fallthrough
CT: control target
= control target key end

     0   :  { %6 = vsyncpa [#allocation3], 0  ;;  %s693_s0 = inlined_call_operand.hbm [shape: f32[2,4,256], index: 0, kind: input, shape index: {}]   ;;  %s694_s1 = inlined_call_operand.hbm [shape: f32[2,4,256], index: 1, kind: output, shape index: {}]  }
   0x1   :  { %8 = vsyncpa [#allocation3 + $0x1], 0 }
   0x2   :  { %9 = vsyncpa [#allocation4], 0 }
   0x3   :  { %11 = vsyncpa [#allocation4 + $0x1], 0  ;;  %s555_s6 = smov 0   ;;  %s557_s7 = smov 0  }
   0x4   :  { %s559_s8 = smov 0   ;;  %s561_s9 = smov 0  }
   0x5   :  { %s563_s10 = smov 0   ;;  %s565_s11 = smov 0  }
   0x6 LB: > { %s344_s12 = sadd.s32 4294967295, %s543_s11   ;;  %s345_s13 = sadd.s32 4294967294, %s543_s11   ;;  %s543_s11 = sphi %s565_s11, %s17_s11   ;;  %s539_s10 = sphi %s563_s10, %s705_s10   ;;  %s535_s9 = sphi %s561_s9, %s704_s9   ;;  %s531_s8 = sphi %s559_s8, %s703_s8   ;;  %s527_s7 = sphi %s557_s7, %s702_s7   ;;  %s523_s6 = sphi %s555_s6, %s701_s6  }
   0x7   : > { %s29_s14 = sadd.s32 1, %s539_s10  ;;  %s38_s15 = sadd.s32 1, %s531_s8 }
   0x8   : > { %p31_p0 = scmp.ge.s32.totalorder %s29_s14, 2  ;;  %p45_p1 = scmp.ne.s32.totalorder %s531_s8, %s527_s7 }
   0x9   : > { %p46_p2 = scmp.eq.s32.totalorder %s543_s11, 0  ;;  %p51_p3 = scmp.ne.s32.totalorder %s527_s7, %s523_s6 }
   0xa   : > { %s707_s14 = smov (%p31_p0, %s29_s14), 0  ;;  %p52_p5 = scmp.eq.s32.totalorder %s344_s12, 0 }
   0xb   : > { %p596_p4 = por %p46_p2, %p45_p1  ;;  %s33_s17 = ssub.s32 %s539_s10, %s707_s14 }
   0xc   : > { %p77_p6 = scmp.eq.s32.totalorder %s344_s12, 1  ;;  %p36_p7 = scmp.eq.s32.totalorder %s33_s17, 0 }
   0xd   : > { %p602_p8 = por %p52_p5, %p51_p3  ;;  %p83_p10 = scmp.eq.s32.totalorder %s345_s13, 1 }
   0xe   : > { %p606_p9 = por %p77_p6, %p45_p1  ;;  %p347_p12 = scmp.ge.s32.totalorder %s543_s11, 2 }
   0xf   : > { %s611_s20 = scalar_select %p36_p7, %s531_s8, %s38_s15  }
  0x10   : > { %p613_p11 = por %p83_p10, %p51_p3  ;;  %p373_p13 = scmp.lt.s32.totalorder %s543_s11, 2 }
  0x11   : > { %s103_s22 = sand.u32 1, %s531_s8   ;;  %s359_s24 = sshll.u32 %s539_s10, 3 }
  0x12   : > { %s348_s23 = sshll.u32 %s103_s22, 3  ;;  %s114_s27 = scalar_lea.hbm %s693_s0, %s359_s24 }
  0x13   : > { %s107_s28 = scalar_lea.vmem [#allocation2], %s348_s23  ;;  %s116_s30 = sshll.u32 %s114_s27, 4  ;;  %s117_s30 = int_to_ptr.hbm [resolvable:$true] %s116_s30 }
  0x14   : > { %s118_s29 = sshll.u32 %s107_s28, 4  ;;  %p366_p0 = pnand %p373_p13, %p596_p4  ;;  %s119_s29 = int_to_ptr.vmem [resolvable:$true] %s118_s29 }
  0x15   : > { %p351_p1 = scmp.ge.s32.totalorder %s543_s11, 1  ;;  %p123_p2 = scmp.lt.s32.totalorder %s543_s11, 3 }
  0x16   : > { %s104_s2 = scalar_lea.sflag [#allocation3], %s103_s22 }
  0x17   : > { %368 = dma.hbm_to_vmem [thread:$0]  (!%p366_p0), %s117_s30, 128, %s119_s29, %s104_s2  }
  0x18   : > { %p124_p3 = pnand %p351_p1, %p123_p2 }
  0x19   : > { %s629_s3 = sand.u32 (!%p124_p3), 1, %s527_s7  }
  0x1a   : > { %127 = sbr.rel (%p124_p3) target bundleno = 105 (0x69), region = 24  ;;  %s352_s4 = sshll.u32 (!%p124_p3), %s629_s3, 3 }
  0x1b   : > { %s130_s5 = scalar_lea.sflag (!%p124_p3), [#allocation3], %s629_s3  ;;  %s133_s12 = scalar_lea.vmem (!%p124_p3), [#allocation2], %s352_s4 }
  0x1f   : > { %514 = dma.done.wait (%p602_p8), %s130_s5, 128  }
  0x20   : > { %516 = vsyncadd (%p602_p8), %s130_s5, 4294967168  ;;  %v639_v0 = vld [vmem:[%s133_s12] sm:$0xff]  ;;  %vm163_vm0 = vcmask 1043456   ;;  %s360_s13 = sshll.u32 %s535_s9, 3  ;;  %s152_s9 = scalar_lea.vmem [#allocation5], %s352_s4 }
  0x21   : > { %v156_v1 = vmul.f32 %v639_v0, %v639_v0  ;;  %s255_s17 = scalar_lea.hbm %s694_s1, %s360_s13  ;;  %s257_s18 = sshll.u32 %s152_s9, 4  ;;  %s258_s18 = int_to_ptr.vmem [resolvable:$true] %s257_s18 }
  0x22   : > { %s259_s22 = sshll.u32 %s255_s17, 4  ;;  %s242_s23 = scalar_lea.sflag [#allocation4], %s629_s3  ;;  %s260_s22 = int_to_ptr.hbm [resolvable:$true] %s259_s22 }
  0x23   : > { %158 = vst [vmem:[#allocation1] ss:$2 sm:$0xff] %v156_v1  ;;  %s475_s24 = sshra.s32 %s260_s22, 4  ;;  %s481_s28 = scalar_lea.hbm %s694_s1, 16  ;;  %s476_s24 = int_to_ptr.hbm [resolvable:$true] %s475_s24 }
  0x24   : > { %s477_s25 = scalar_lea.hbm %s476_s24, 8  ;;  %p482_p7 = scmp.lt.s32.totalorder %s476_s24, %s694_s1 }
  0x25   : > { %p478_p4 = scmp.ne.s32.totalorder %s476_s24, %s477_s25  ;;  %p483_p8 = scmp.lt.s32.totalorder %s481_s28, %s477_s25 }
  0x27   : > { %p479_p5 = pnand %p478_p4, %p606_p9  ;;  %p484_p10 = por %p483_p8, %p482_p7 }
  0x29   : > { %p480_p6 = pneg %p479_p5 }
  0x2a   : > { %v159_v2 = vld.sshfl [vmem:[#allocation1] sm:$0xff pattern:$0x75316420]  ;;  %v160_v3 = vld.sshfl [vmem:[#allocation1 + $0x8] sm:$0xff pattern:$0x75316420] }
  0x2b   : > { %v164_v4 = vsel %vm163_vm0, %v159_v2, 0.0  ;;  %v171_v5 = vsel %vm163_vm0, %v160_v3, 0.0  ;;  %p485_p13 = pnand %p484_p10, %p480_p6 }
  0x2c   : > { %v165_v6 = vrot.slane %v164_v4, 4  ;;  %v172_v7 = vrot.slane %v171_v5, 4 }
  0x2e   : > { %v166_v8 = vadd.f32 %v165_v6, %v164_v4  ;;  %v173_v9 = vadd.f32 %v172_v7, %v171_v5 }
  0x30   : > { %v167_v10 = vrot.slane %v166_v8, 2  ;;  %v174_v11 = vrot.slane %v173_v9, 2 }
  0x32   : > { %v168_v12 = vadd.f32 %v167_v10, %v166_v8  ;;  %v175_v13 = vadd.f32 %v174_v11, %v173_v9 }
  0x34   : > { %v169_v14 = vrot.slane %v168_v12, 1  ;;  %v176_v15 = vrot.slane %v175_v13, 1 }
  0x36   : > { %v170_v16 = vadd.f32 %v169_v14, %v168_v12  ;;  %v177_v17 = vadd.f32 %v176_v15, %v175_v13 }
  0x38   : > { %423 = vrsqrt.f32 %v170_v16  ;;  %vm185_vm1 = vcmp.eq.f32.partialorder %v170_v16, inf  ;;  %v188_v31 = vand.u32 2147483648, %v170_v16  ;;  %vm187_vm2 = vcmp.eq.f32.partialorder %v170_v16, 0.0 }
  0x39   : > { %425 = vrsqrt.f32 %v177_v17  ;;  %vm197_vm3 = vcmp.eq.f32.partialorder %v177_v17, inf  ;;  %v200_v34 = vand.u32 2147483648, %v177_v17  ;;  %vm199_vm4 = vcmp.eq.f32.partialorder %v177_v17, 0.0 }
  0x3e   : > { %v424_v18 = vpop.eup %423 }
  0x3f   : > { %v426_v19 = vpop.eup %425  ;;  %v179_v20 = vmul.f32 %v424_v18, %v170_v16 }
  0x40   : > { %v191_v21 = vmul.f32 %v426_v19, %v177_v17 }
  0x41   : > { %v180_v22 = vmul.f32 %v424_v18, %v179_v20 }
  0x42   : > { %v192_v23 = vmul.f32 %v426_v19, %v191_v21 }
  0x43   : > { %v181_v24 = vmul.f32 0.5, %v180_v22 }
  0x44   : > { %v193_v25 = vmul.f32 0.5, %v192_v23 }
  0x45   : > { %v182_v26 = vsub.f32 1.5, %v181_v24 }
  0x46   : > { %v194_v27 = vsub.f32 1.5, %v193_v25 }
  0x47   : > { %v183_v28 = vmul.f32 %v424_v18, %v182_v26 }
  0x48   : > { %v195_v29 = vmul.f32 %v426_v19, %v194_v27 }
  0x49   : > { %v184_v30 = vmul.f32 %v183_v28, %v170_v16 }
  0x4a   : > { %v196_v32 = vmul.f32 %v195_v29, %v177_v17 }
  0x4b   : > { %v186_v33 = vsel %vm185_vm1, %v170_v16, %v184_v30 }
  0x4c   : > { %v189_v35 = vsel %vm187_vm2, %v188_v31, %v186_v33  ;;  %v198_v36 = vsel %vm197_vm3, %v177_v17, %v196_v32 }
  0x4d   : > { %v201_v37 = vsel %vm199_vm4, %v200_v34, %v198_v36  ;;  %v202_v38 = vadd.f32 1e-07, %v189_v35 }
  0x4e   : > { %v203_v39 = vadd.f32 1e-07, %v201_v37 }
  0x4f   : > { %427 = vrcp.f32 %v202_v38  ;;  %vm209_vm7 = vweird.f32 %v202_v38  ;;  %v215_v51 = vand.u32 2147483648, %v202_v38  ;;  %v213_v53 = vand.u32 2147483647, %v202_v38 }
  0x50   : > { %429 = vrcp.f32 %v203_v39  ;;  %v230_v47 = vand.u32 2147483648, %v203_v39  ;;  %v228_v49 = vand.u32 2147483647, %v203_v39  ;;  %vm224_vm9 = vweird.f32 %v203_v39 }
  0x51   : > { %v216_v58 = vor.u32 1.1754944e-38, %v215_v51  ;;  %vm214_vm12 = vcmp.eq.f32.partialorder %v213_v53, 8.507059e+37 }
  0x52   : > { %v231_v55 = vor.u32 1.1754944e-38, %v230_v47  ;;  %vm229_vm11 = vcmp.eq.f32.partialorder %v228_v49, 8.507059e+37 }
  0x55   : > { %v428_v40 = vpop.eup %427 }
  0x56   : > { %v430_v41 = vpop.eup %429  ;;  %v205_v42 = vmul.f32 %v428_v40, %v202_v38  ;;  %vm210_vm5 = vweird.f32 %v428_v40 }
  0x57   : > { %v220_v43 = vmul.f32 %v430_v41, %v203_v39  ;;  %vm225_vm6 = vweird.f32 %v430_v41  ;;  %vm646_vm8 = vmor %vm209_vm7, %vm210_vm5 }
  0x58   : > { %v206_v44 = vsub.f32 1.0, %v205_v42  ;;  %vm226_vm10 = vmor %vm224_vm9, %vm225_vm6 }
  0x59   : > { %v221_v45 = vsub.f32 1.0, %v220_v43 }
  0x5a   : > { %v207_v46 = vmul.f32 %v428_v40, %v206_v44 }
  0x5b   : > { %v222_v48 = vmul.f32 %v430_v41, %v221_v45 }
  0x5c   : > { %v208_v50 = vadd.f32 %v428_v40, %v207_v46 }
  0x5d   : > { %v223_v54 = vadd.f32 %v430_v41, %v222_v48 }
  0x5e   : > { %v212_v56 = vsel %vm646_vm8, %v428_v40, %v208_v50 }
  0x5f   : > { %v227_v57 = vsel %vm226_vm10, %v430_v41, %v223_v54  ;;  %v217_v61 = vsel %vm214_vm12, %v216_v58, %v212_v56 }
  0x60   : > { %v232_v59 = vsel %vm229_vm11, %v231_v55, %v227_v57 }
  0x61   : > { %v236_v60 = vrot.slane %v232_v59, 4 }
  0x63   : > { %v237_v62 = vsel %vm163_vm0, %v217_v61, %v236_v60 }
  0x64   : > { %v239_v63 = vmul.f32 %v237_v62, %v639_v0 }
  0x66   : > { %240 = vst [vmem:[%s152_s9] sm:$0xff] %v239_v63 }
  0x67   : > { %488 = shalt.err (!%p485_p13)
}
  0x68   : > { %363 = dma.vmem_to_hbm [thread:$0]  (%p606_p9), %s258_s18, 128, %s260_s22, %s242_s23  }
  0x69 PF: > { %s271_s2 = sand.u32 1, %s523_s6   ;;  %p370_p0 = pnand %p347_p12, %p613_p11 }
  0x6a   : > { %s272_s3 = scalar_lea.sflag [#allocation4], %s271_s2 }
  0x6b   : > { %p371_p1 = pneg %p370_p0 }
  0x6d   : > { %518 = dma.done.wait (%p371_p1), %s272_s3, 128  }
  0x6e   : > { %520 = vsyncadd (%p371_p1), %s272_s3, 4294967168  ;;  %s17_s11 = sadd.s32 1, %s543_s11   ;;  %s701_s6 = smov %s527_s7 }
  0x6f   : > { %p14_p2 = scmp.ge.s32.totalorder %s17_s11, 4   ;;  %s702_s7 = smov %s531_s8 }
  0x70   : > { %s703_s8 = smov %s611_s20  ;;  %s704_s9 = smov %s539_s10 }
  0x71   : > { %s705_s10 = smov %s707_s14  ;;  %16 = sbr.rel (!%p14_p2) target bundleno = 6 (0x6), region = 69 }
  0x76   :  { %278 = vsyncpa [#allocation3], 1 }
  0x77   :  { %280 = vsyncpa [#allocation3 + $0x1], 1 }
  0x78   :  { %281 = vsyncpa [#allocation4], 1 }
  0x79   :  { %283 = vsyncpa [#allocation4 + $0x1], 1 }

</bundles_post_ra>
